<compile_context>
chip_gen: v6e
topology: v6e:2x2x1
jax: 0.10.0
libtpu: 0.0.40
codegen_flags: <defaults>
</compile_context>

<pallas_src>
import functools

import jax
import jax.numpy as jnp
from jax.experimental import pallas as pl
from jax.experimental.pallas import tpu as pltpu


MAX_CHUNK = 2048   # single-chunk path for any T up to this many timesteps


def make_parity_rnn_kernel(t_chunk, b_pad, total_t, n_chunks):
    # If T is an exact multiple of the chunk there is no padded tail and the
    # per-chunk trip count is static (enables unrolling).
    static_trip = (n_chunks * t_chunk == total_t)

    def kernel(x_ref, wih_ref, whh_ref, b_ref, fcw_ref, fcb_ref,
               y_ref, h_carry, h_hist):
        # h_0 = 0 (PyTorch default when no hidden state is passed).
        @pl.when(pl.program_id(0) == 0)
        def _():
            h_carry[...] = jnp.zeros_like(h_carry)

        # Hoisted input projection for the whole chunk: ONE f32 MXU matmul
        # (no serial dependence), bias folded in.  Stored into the 2D history
        # scratch; the loop below overwrites each row-block with h_t in place.
        h_hist[...] = (
            jnp.dot(x_ref[...], wih_ref[...], preferred_element_type=jnp.float32)
            + b_ref[...]
        )

        whh = whh_ref[...]          # (H, H) bf16, loaded once per chunk
        # TODO(synk): keep W_hh resident via pltpu.matmul_push_rhs/acc_lhs/pop;
        # for now the loop-invariant bf16 RHS is left for Mosaic to hoist.

        def step(t, h):
            off = pl.multiple_of(t * b_pad, b_pad)
            pre = h_hist[pl.ds(off, b_pad), :] + jnp.dot(
                h.astype(jnp.bfloat16), whh, preferred_element_type=jnp.float32)
            h = jnp.tanh(pre)
            h_hist[pl.ds(off, b_pad), :] = h   # hidden history for the FC head
            return h

        if static_trip:
            unroll = True if t_chunk <= 128 else 16
            h_final = jax.lax.fori_loop(0, t_chunk, step, h_carry[...],
                                        unroll=unroll)
        else:
            # Last chunk runs only the real timesteps (no garbage recurrence).
            steps = jnp.minimum(t_chunk, total_t - pl.program_id(0) * t_chunk)
            h_final = jax.lax.fori_loop(0, steps, step, h_carry[...])

        h_carry[...] = h_final      # carried across chunks ("arbitrary" axis)

        # FC head once per chunk, off the recurrent path: one MXU matmul on the
        # 2D history, fc bias folded in, single store of the output slab.
        y_ref[...] = (
            jnp.dot(h_hist[...], fcw_ref[...], preferred_element_type=jnp.float32)
            + fcb_ref[0]
        )

    return kernel


def parity_rnn_forward(x, params):
    """x: (B, T, I) float32. Returns (out, None), matching the PyTorch forward."""
    B, T, I = x.shape
    H = params["w_hh"].shape[0]

    B_pad = ((B + 7) // 8) * 8                       # sublane multiple
    t_chunk = T if T <= MAX_CHUNK else MAX_CHUNK
    n_chunks = pl.cdiv(T, t_chunk)
    T_pad = n_chunks * t_chunk                       # == T whenever T <= MAX_CHUNK

    # Flat time-major 2D input slab: (T_pad*B_pad, I).  Built once in XLA so the
    # kernel never reshapes (in-kernel reshapes are not views).
    xt = jnp.swapaxes(x, 0, 1)                                   # (T, B, I)
    xt = jnp.pad(xt, ((0, T_pad - T), (0, B_pad - B), (0, 0)))
    x2d = xt.reshape(T_pad * B_pad, I).astype(jnp.float32)

    wih_t = params["w_ih"].T.astype(jnp.float32)                 # (I, H)
    whh_t = params["w_hh"].T.astype(jnp.bfloat16)                # (H, H) bf16 MXU operand
    bias = (params["b_ih"] + params["b_hh"]).reshape(1, H).astype(jnp.float32)
    fcw_col = params["fc_w"].reshape(H, 1).astype(jnp.float32)   # (H, 1)
    fcb = params["fc_b"].reshape(1).astype(jnp.float32)          # (1,) SMEM scalar

    kernel = make_parity_rnn_kernel(t_chunk, B_pad, T, n_chunks)

    y = pl.pallas_call(
        kernel,
        out_shape=jax.ShapeDtypeStruct((T_pad * B_pad, 1), jnp.float32),
        grid=(n_chunks,),
        in_specs=[
            pl.BlockSpec((t_chunk * B_pad, I), lambda c: (c, 0)),   # x chunk (2D)
            pl.BlockSpec((I, H), lambda c: (0, 0)),                 # W_ih^T
            pl.BlockSpec((H, H), lambda c: (0, 0)),                 # W_hh^T (bf16)
            pl.BlockSpec((1, H), lambda c: (0, 0)),                 # b_ih + b_hh
            pl.BlockSpec((H, 1), lambda c: (0, 0)),                 # fc weight column
            pl.BlockSpec(memory_space=pltpu.MemorySpace.SMEM),      # fc bias scalar
        ],
        out_specs=pl.BlockSpec((t_chunk * B_pad, 1), lambda c: (c, 0)),
        scratch_shapes=[
            pltpu.VMEM((B_pad, H), jnp.float32),               # carried hidden state
            pltpu.VMEM((t_chunk * B_pad, H), jnp.float32),     # x-proj / h_t history
        ],
        compiler_params=pltpu.CompilerParams(
            dimension_semantics=("arbitrary",)),                # serial over chunks
    )(x2d, wih_t, whh_t, bias, fcw_col, fcb)

    # Tiny XLA-side reshuffle: (T_pad*B_pad, 1) -> (B, T, 1), drop padding.
    y_tb = y.reshape(T_pad, B_pad)[:T, :B]                       # (T, B)
    fc_out = jnp.swapaxes(y_tb, 0, 1)[..., None]                 # (B, T, 1)

    # Emulate torch's .squeeze(1).squeeze(1) (only squeezes size-1 dims).
    out = fc_out
    if out.shape[1] == 1:
        out = jnp.squeeze(out, axis=1)                           # (B, 1)
        if out.ndim > 1 and out.shape[1] == 1:
            out = jnp.squeeze(out, axis=1)                       # (B,)
    # The PyTorch module's forward returns (output, None) explicitly.
    return out, None


def init_params(key, input_size, hidden_size):
    """Deterministic init mirroring PyTorch RNN/Linear reset_parameters (U(-k, k))."""
    k_rnn = 1.0 / jnp.sqrt(hidden_size)
    k_fc = 1.0 / jnp.sqrt(hidden_size)
    ks = jax.random.split(key, 6)
    u = lambda kk, shape, k: jax.random.uniform(kk, shape, jnp.float32, -k, k)
    return {
        "w_ih": u(ks[0], (hidden_size, input_size), k_rnn),
        "w_hh": u(ks[1], (hidden_size, hidden_size), k_rnn),
        "b_ih": u(ks[2], (hidden_size,), k_rnn),
        "b_hh": u(ks[3], (hidden_size,), k_rnn),
        "fc_w": u(ks[4], (1, hidden_size), k_fc),
        "fc_b": u(ks[5], (1,), k_fc),
    }


def _reference_forward(x, params, recurrent_dtype=jnp.float32):
    """Pure-JAX reference of the PyTorch forward.

    recurrent_dtype=jnp.bfloat16 mirrors the kernel's bf16 MXU operands on the
    recurrent dot (f32 accumulation); jnp.float32 is the exact module math.
    """
    B, T, I = x.shape
    H = params["w_hh"].shape[0]
    hi = jax.lax.Precision.HIGHEST
    wih_t = params["w_ih"].T
    whh_t = params["w_hh"].T.astype(recurrent_dtype)
    bias = params["b_ih"] + params["b_hh"]

    def step(h, x_t):
        pre = (jnp.dot(x_t, wih_t, precision=hi) + bias
               + jnp.dot(h.astype(recurrent_dtype), whh_t, precision=hi,
                         preferred_element_type=jnp.float32))
        h = jnp.tanh(pre)
        y = jnp.dot(h, params["fc_w"].T, precision=hi) + params["fc_b"]
        return h, y

    h0 = jnp.zeros((B, H), jnp.float32)
    _, ys = jax.lax.scan(step, h0, jnp.swapaxes(x, 0, 1))        # (T, B, 1)
    fc_out = jnp.swapaxes(ys, 0, 1)                              # (B, T, 1)

    out = fc_out
    if out.shape[1] == 1:
        out = jnp.squeeze(out, axis=1)
        if out.ndim > 1 and out.shape[1] == 1:
            out = jnp.squeeze(out, axis=1)
    return out


if __name__ == "__main__":
    I, H = 16, 32                       # parity input size, rnn_size
    key = jax.random.PRNGKey(0)
    k_params, k1, k2, k3 = jax.random.split(key, 4)
    params = init_params(k_params, I, H)

    # (B, T) cases: T==1 squeeze path, short T>1, long single-chunk T=300.
    cases = [(2, 1), (2, 8), (2, 300)]
    case_keys = [k1, k2, k3]
    # Tolerances vs. a reference with matching bf16 recurrent-dot precision ...
    tol_matched = {1: 1e-4, 8: 3e-3, 300: 2e-2}
    # ... and (looser) vs. the exact f32 module math: bf16 MXU operands on the
    # recurrent dot are the documented precision tradeoff from the perf review.
    tol_f32 = {1: 1e-3, 8: 3e-2, 300: 1.5e-1}

    for (B, T), kk in zip(cases, case_keys):
        # parity-style input: entries in {-1, 0, +1}
        x = jax.random.randint(kk, (B, T, I), -1, 2).astype(jnp.float32)

        out, hidden = parity_rnn_forward(x, params)
        out = jax.block_until_ready(out)

        ref_m = _reference_forward(x, params, jnp.bfloat16)
        ref_f = _reference_forward(x, params, jnp.float32)

        assert out.shape == ref_f.shape, (B, T, out.shape, ref_f.shape)
        assert jnp.allclose(out, ref_m, atol=tol_matched[T], rtol=tol_matched[T]), (
            "matched-precision", B, T, float(jnp.max(jnp.abs(out - ref_m))))
        assert jnp.allclose(out, ref_f, atol=tol_f32[T], rtol=0.0), (
            "f32-reference", B, T, float(jnp.max(jnp.abs(out - ref_f))))
        assert hidden is None

    print("KERNEL_OK")
</pallas_src>

<mosaic_0001>
module attributes {stable_mosaic.version = 11 : i64} {
  func.func @kernel(%arg0: i32, %arg1: memref<8x16xf32, #tpu.memory_space<vmem>>, %arg2: memref<16x32xf32, #tpu.memory_space<vmem>>, %arg3: memref<32x32xbf16, #tpu.memory_space<vmem>>, %arg4: memref<1x32xf32, #tpu.memory_space<vmem>>, %arg5: memref<32x1xf32, #tpu.memory_space<vmem>>, %arg6: memref<1xf32, #tpu.memory_space<smem>>, %arg7: memref<8x1xf32, #tpu.memory_space<vmem>>, %arg8: memref<8x32xf32, #tpu.memory_space<vmem>>, %arg9: memref<8x32xf32, #tpu.memory_space<vmem>>) attributes {dimension_semantics = [#tpu.dimension_semantics<arbitrary>], iteration_bounds = array<i64: 1>, scalar_prefetch = 0 : i64, scratch_operands = 2 : i64, tpu.core_type = #tpu.core_type<tc>, window_params = [{transform_indices = @transform_0, window_bounds = array<i64: 8, 16>}, {pipeline_mode = #tpu.pipeline_mode<synchronous>, transform_indices = @transform_1, window_bounds = array<i64: 16, 32>}, {pipeline_mode = #tpu.pipeline_mode<synchronous>, transform_indices = @transform_2, window_bounds = array<i64: 32, 32>}, {pipeline_mode = #tpu.pipeline_mode<synchronous>, transform_indices = @transform_3, window_bounds = array<i64: 1, 32>}, {pipeline_mode = #tpu.pipeline_mode<synchronous>, transform_indices = @transform_4, window_bounds = array<i64: 32, 1>}, {transform_indices = @transform_5, window_bounds = array<i64: 1>}, {transform_indices = @transform_6, window_bounds = array<i64: 8, 1>}]} {
    %c0_i32 = arith.constant 0 : i32
    %0 = arith.cmpi eq, %arg0, %c0_i32 : i32
    %1 = arith.extui %0 : i1 to i32
    %c0_i32_0 = arith.constant 0 : i32
    %2 = arith.cmpi ne, %1, %c0_i32_0 : i32
    scf.if %2 {
      %cst_26 = arith.constant 0.000000e+00 : f32
      %30 = vector.broadcast %cst_26 : f32 to vector<8x32xf32>
      %c0_27 = arith.constant 0 : index
      %c0_28 = arith.constant 0 : index
      %31 = vector.load %arg8[%c0_27, %c0_28] : memref<8x32xf32, #tpu.memory_space<vmem>>, vector<8x32xf32>
      tpu.vector_store %arg8[%c0_27, %c0_28], %30 {strides = array<i32>} : memref<8x32xf32, #tpu.memory_space<vmem>>, vector<8x32xf32>,
    } else {
    }
    %c0 = arith.constant 0 : index
    %c0_1 = arith.constant 0 : index
    %3 = vector.load %arg1[%c0, %c0_1] : memref<8x16xf32, #tpu.memory_space<vmem>>, vector<8x16xf32>
    %c0_2 = arith.constant 0 : index
    %c0_3 = arith.constant 0 : index
    %4 = vector.load %arg2[%c0_2, %c0_3] : memref<16x32xf32, #tpu.memory_space<vmem>>, vector<16x32xf32>
    %cst = arith.constant dense<0.000000e+00> : vector<8x32xf32>
    %5 = tpu.matmul %3, %4, %cst {dimension_numbers = #tpu.dot_dimension_numbers<[1], [0], [0], [1], [0, 0, 1, 1], [], []>} : vector<8x16xf32>, vector<16x32xf32>, vector<8x32xf32> -> vector<8x32xf32>
    %c0_4 = arith.constant 0 : index
    %c0_5 = arith.constant 0 : index
    %6 = vector.load %arg4[%c0_4, %c0_5] : memref<1x32xf32, #tpu.memory_space<vmem>>, vector<1x32xf32>
    %7 = vector.broadcast %6 : vector<1x32xf32> to vector<8x32xf32>
    %8 = arith.addf %5, %7 : vector<8x32xf32>
    %c0_6 = arith.constant 0 : index
    %c0_7 = arith.constant 0 : index
    %9 = vector.load %arg9[%c0_6, %c0_7] : memref<8x32xf32, #tpu.memory_space<vmem>>, vector<8x32xf32>
    tpu.vector_store %arg9[%c0_6, %c0_7], %8 {strides = array<i32>} : memref<8x32xf32, #tpu.memory_space<vmem>>, vector<8x32xf32>,
    %c0_8 = arith.constant 0 : index
    %c0_9 = arith.constant 0 : index
    %10 = vector.load %arg3[%c0_8, %c0_9] : memref<32x32xbf16, #tpu.memory_space<vmem>>, vector<32x32xbf16>
    %c0_10 = arith.constant 0 : index
    %c0_11 = arith.constant 0 : index
    %11 = vector.load %arg8[%c0_10, %c0_11] : memref<8x32xf32, #tpu.memory_space<vmem>>, vector<8x32xf32>
    %c0_i32_12 = arith.constant 0 : i32
    %c8_i32 = arith.constant 8 : i32
    %12 = arith.muli %c0_i32_12, %c8_i32 : i32
    %13 = tpu.assume_multiple %12, 8 : i32
    %14 = arith.index_cast %13 : i32 to index
    %c0_13 = arith.constant 0 : index
    %15 = vector.load %arg9[%14, %c0_13] : memref<8x32xf32, #tpu.memory_space<vmem>>, vector<8x32xf32>
    %16 = arith.truncf %11 : vector<8x32xf32> to vector<8x32xbf16>
    %cst_14 = arith.constant dense<0.000000e+00> : vector<8x32xf32>
    %17 = tpu.matmul %16, %10, %cst_14 {dimension_numbers = #tpu.dot_dimension_numbers<[1], [0], [0], [1], [0, 0, 1, 1], [], []>} : vector<8x32xbf16>, vector<32x32xbf16>, vector<8x32xf32> -> vector<8x32xf32>
    %18 = arith.addf %15, %17 : vector<8x32xf32>
    %19 = math.tanh %18 : vector<8x32xf32>
    %20 = arith.index_cast %13 : i32 to index
    %c0_15 = arith.constant 0 : index
    %21 = vector.load %arg9[%20, %c0_15] : memref<8x32xf32, #tpu.memory_space<vmem>>, vector<8x32xf32>
    tpu.vector_store %arg9[%20, %c0_15], %19 {strides = array<i32>} : memref<8x32xf32, #tpu.memory_space<vmem>>, vector<8x32xf32>,
    %c1_i32 = arith.constant 1 : i32
    %c0_16 = arith.constant 0 : index
    %c0_17 = arith.constant 0 : index
    %22 = vector.load %arg8[%c0_16, %c0_17] : memref<8x32xf32, #tpu.memory_space<vmem>>, vector<8x32xf32>
    tpu.vector_store %arg8[%c0_16, %c0_17], %19 {strides = array<i32>} : memref<8x32xf32, #tpu.memory_space<vmem>>, vector<8x32xf32>,
    %c0_18 = arith.constant 0 : index
    %c0_19 = arith.constant 0 : index
    %23 = vector.load %arg9[%c0_18, %c0_19] : memref<8x32xf32, #tpu.memory_space<vmem>>, vector<8x32xf32>
    %c0_20 = arith.constant 0 : index
    %c0_21 = arith.constant 0 : index
    %24 = vector.load %arg5[%c0_20, %c0_21] : memref<32x1xf32, #tpu.memory_space<vmem>>, vector<32x1xf32>
    %cst_22 = arith.constant dense<0.000000e+00> : vector<8x1xf32>
    %25 = tpu.matmul %23, %24, %cst_22 {dimension_numbers = #tpu.dot_dimension_numbers<[1], [0], [0], [1], [0, 0, 1, 1], [], []>} : vector<8x32xf32>, vector<32x1xf32>, vector<8x1xf32> -> vector<8x1xf32>
    %c0_23 = arith.constant 0 : index
    %26 = memref.load %arg6[%c0_23] : memref<1xf32, #tpu.memory_space<smem>>
    %27 = vector.broadcast %26 : f32 to vector<8x1xf32>
    %28 = arith.addf %25, %27 : vector<8x1xf32>
    %c0_24 = arith.constant 0 : index
    %c0_25 = arith.constant 0 : index
    %29 = vector.load %arg7[%c0_24, %c0_25] : memref<8x1xf32, #tpu.memory_space<vmem>>, vector<8x1xf32>
    tpu.vector_store %arg7[%c0_24, %c0_25], %28 {strides = array<i32>} : memref<8x1xf32, #tpu.memory_space<vmem>>, vector<8x1xf32>,
    return
  }
  func.func @transform_0(%arg0: i32) -> (i32, i32) {
    %c0_i32 = arith.constant 0 : i32
    %c0_i32_0 = arith.constant 0 : i32
    return %arg0, %c0_i32 : i32, i32
  }
  func.func @transform_1(%arg0: i32) -> (i32, i32) {
    %c0_i32 = arith.constant 0 : i32
    %c0_i32_0 = arith.constant 0 : i32
    %c0_i32_1 = arith.constant 0 : i32
    return %c0_i32, %c0_i32_0 : i32, i32
  }
  func.func @transform_2(%arg0: i32) -> (i32, i32) {
    %c0_i32 = arith.constant 0 : i32
    %c0_i32_0 = arith.constant 0 : i32
    %c0_i32_1 = arith.constant 0 : i32
    return %c0_i32, %c0_i32_0 : i32, i32
  }
  func.func @transform_3(%arg0: i32) -> (i32, i32) {
    %c0_i32 = arith.constant 0 : i32
    %c0_i32_0 = arith.constant 0 : i32
    %c0_i32_1 = arith.constant 0 : i32
    return %c0_i32, %c0_i32_0 : i32, i32
  }
  func.func @transform_4(%arg0: i32) -> (i32, i32) {
    %c0_i32 = arith.constant 0 : i32
    %c0_i32_0 = arith.constant 0 : i32
    %c0_i32_1 = arith.constant 0 : i32
    return %c0_i32, %c0_i32_0 : i32, i32
  }
  func.func @transform_5(%arg0: i32) -> i32 {
    %c0_i32 = arith.constant 0 : i32
    %c0_i32_0 = arith.constant 0 : i32
    return %c0_i32 : i32
  }
  func.func @transform_6(%arg0: i32) -> (i32, i32) {
    %c0_i32 = arith.constant 0 : i32
    %c0_i32_0 = arith.constant 0 : i32
    return %arg0, %c0_i32 : i32, i32
  }
}

</mosaic_0001>

<bundles_post_ra>
// kernel: tpu_custom_call.1
= control target key start
LH: loop header
LB: loop body
LE: loop exit
PB: predicated region body
PF: predicated region fallthrough
CT: control target
= control target key end

     0   :  { %12 = vsyncpa [#allocation6], 0  ;;  %s354_s21 = smov [#allocation5]   ;;  %s437_s0 = inlined_call_operand.hbm [shape: f32[8,16], index: 0, kind: input, shape index: {}]   ;;  %s438_s1 = inlined_call_operand.vmem [shape: f32[16,32], index: 1, kind: input, shape index: {}]   ;;  %s439_s2 = inlined_call_operand.vmem [shape: bf16[32,32], index: 2, kind: input, shape index: {}]   ;;  %s440_s3 = inlined_call_operand.vmem [shape: f32[1,32], index: 3, kind: input, shape index: {}]   ;;  %s441_s4 = inlined_call_operand.vmem [shape: f32[32,1], index: 4, kind: input, shape index: {}]   ;;  %s442_s5 = inlined_call_operand.<no memory space> [shape: f32[1], index: 5, kind: input, shape index: {}]   ;;  %s443_s6 = inlined_call_operand.vmem [shape: f32[8,1], index: 6, kind: output, shape index: {}]  }
   0x1   :  { %s19_s22 = sshll.u32 %s354_s21, 4  ;;  %s20_s22 = int_to_ptr.vmem [resolvable:$true] %s19_s22 }
   0x2   :  { %s340_s23 = scalar_lea.vmem %s20_s22, 128  ;;  %p345_p1 = scmp.lt.s32.totalorder %s20_s22, %s20_s22 }
   0x3   :  { %p341_p0 = scmp.ne.s32.totalorder %s20_s22, %s340_s23  ;;  %p346_p2 = scmp.lt.s32.totalorder %s340_s23, %s340_s23 }
   0x5   :  { %p347_p3 = por %p346_p2, %p345_p1 }
   0x7   :  { %p348_p4 = pnand %p347_p3, %p341_p0 }
   0x9   :  { %351 = shalt.err (!%p348_p4)
}
   0xa   :  { %22 = dma.hbm_to_vmem [thread:$0]  %s437_s0, 128, %s20_s22, [#allocation6]  }
   0xb   :  { %352 = dma.done.wait [#allocation6], 128  }
   0xc   :  { %353 = vsyncadd [#allocation6], 4294967168  ;;  %vm41_vm0 = vcmask 261120   ;;  %v355_v0 = vmov 0.0   ;;  %vm356_vm1 = vmmov 0   ;;  %v45_v1 = vld [vmem:[%s438_s1 + $0x8] sm:$0xff]  ;;  %v201_v24 = vstv %s442_s5 }
   0xd   :  { %299 = vmatprep.subr.mxu0 %v355_v0  ;;  %306 = vmatprep.subr.bf16.mxu1 %v355_v0  ;;  %42 = vst.msk [vmem:[#allocation2] sm:$0xff] %vm41_vm0, %v355_v0  ;;  %v44_v2 = vld [vmem:[%s438_s1] sm:$0xff]  ;;  %v328_v3 = vld [vmem:[%s439_s2 + $0x8] sm:$0xff]   ;;  %v43_v4 = vld [vmem:[#allocation5] sm:$0xff]  ;;  %vm53_vm2 = vcmask 130048   ;;  %vm275_vm3 = vcmask 7168  }
   0xe   :  { %303 = vmatprep.mubr.msk.f32.mxu0 %vm356_vm1, %v355_v0  ;;  %310 = vmatprep.mubr.msk.bf16.mxu1 %vm356_vm1, %v355_v0  ;;  %v329_v5 = vld [vmem:[%s439_s2] sm:$0xff]   ;;  %v199_v8 = vld [vmem:[%s441_s4 + $0x18] sm:$0xff]  ;;  %v198_v9 = vld [vmem:[%s441_s4 + $0x10] sm:$0xff] }
   0xf   :  { %300 = vmatpush3.msra.mxu0 %v45_v1  ;;  %307 = vmatpush3.bf16.msra.mxu1 %v328_v3  ;;  %v197_v10 = vld [vmem:[%s441_s4 + $0x8] sm:$0xff]  ;;  %v196_v11 = vld [vmem:[%s441_s4] sm:$0xff] }
  0x10   :  { %301 = vmatprep.subr.mxu0 %v355_v0  ;;  %308 = vmatprep.subr.bf16.mxu1 %v355_v0  ;;  %v282_v12 = vld [vmem:[%s440_s3] ss:$0 sm:$0xff] }
  0x11   :  { %302 = vmatpush3.msra.mxu0 %v44_v2 }
  0x12   :  { %304 = vmatmul.mubr.msk.f32.vlgmr.msra.gmra.mxu0 %vm53_vm2, %v43_v4  ;;  %314 = vmatprep.subr.mxu0 %v355_v0 }
  0x13   :  { %322 = vmatprep.mubr.msk.f32.mxu0 %vm356_vm1, %v355_v0  ;;  %309 = vmatpush3.bf16.msra.mxu1 %v329_v5 }
  0x14   :  { %v133_v6 = vld [vmem:[#allocation2] sm:$0xff]  ;;  %315 = vmatpush3.msra.mxu0 %v199_v8 }
  0x15   :  { %v135_v7 = vpack.c.bf16 %v133_v6, %v133_v6  ;;  %316 = vmatprep.subr.mxu0 %v355_v0 }
  0x16   :  { %317 = vmatpush3.msra.mxu0 %v198_v9 }
  0x17   :  { %311 = vmatmul.mubr.msk.bf16.vlgmr.msra.gmra.mxu1 %vm41_vm0, %v135_v7  ;;  %318 = vmatprep.subr.mxu0 %v355_v0 }
  0x18   :  { %319 = vmatpush3.msra.mxu0 %v197_v10 }
  0x19   :  { %320 = vmatprep.subr.mxu0 %v355_v0 }
  0x1a   :  { %321 = vmatpush3.msra.mxu0 %v196_v11 }
  0xd2   :  { %v123_v13 = vpop.f32.mrf.mxu0 }
  0xd3   :  { %v124_v14 = vadd.f32 %v282_v12, %v123_v13 }
  0xd4   :  { %v305_v15 = vpop.f32.mrf.mxu0 }
  0xd5   :  { %128 = vst.msk [vmem:[#allocation3] sm:$0xff] %vm41_vm0, %v124_v14 }
  0xd7   :  { %v185_v16 = vpop.f32.mrf.mxu1 }
  0xd9   :  { %v312_v17 = vpop.f32.mrf.mxu1 }
  0xdb   :  { %v188_v19 = vpop.f32.mrf.mxu1 }
  0xdc   :  { %v134_v18 = vld [vmem:[#allocation3] sm:$0xff] }
  0xdd   :  { %v191_v20 = vadd.f32 %v185_v16, %v134_v18  ;;  %v313_v21 = vpop.f32.mrf.mxu1 }
  0xdf   :  { %330 = vtanh.f32 %v191_v20 }
  0xec   :  { %v331_v22 = vpop.eup %330 }
  0xed   :  { %193 = vst.msk [vmem:[#allocation3] sm:$0xff] %vm41_vm0, %v331_v22  ;;  %194 = vst.msk [vmem:[#allocation2] sm:$0xff] %vm41_vm0, %v331_v22 }
  0xf4   :  { %v195_v23 = vld [vmem:[#allocation3] sm:$0xff] }
  0xf5   :  { %323 = vmatmul.mubr.msk.f32.vlgmr.msra.gmra.mxu0 %vm41_vm0, %v195_v23 }
 0x1b5   :  { %v271_v25 = vpop.f32.mrf.mxu0 }
 0x1b6   :  { %v272_v26 = vadd.f32 %v271_v25, %v201_v24 }
 0x1b7   :  { %v324_v27 = vpop.f32.mrf.mxu0 }
 0x1b8   :  { %276 = vst.msk [vmem:[%s443_s6] sm:$0xff] %vm275_vm3, %v272_v26 }
 0x1b9   :  { %281 = vsyncpa [#allocation6], 1 }

</bundles_post_ra>
